<compile_context>
chip_gen: v5e
topology: v5e:2x2
jax: 0.10.0
libtpu: 0.0.40
codegen_flags: <defaults>
</compile_context>

<pallas_src>
import functools

import jax
import jax.numpy as jnp
from jax import lax
from jax.experimental import pallas as pl
from jax.experimental.pallas import tpu as pltpu


# ------------------------------- utilities -------------------------------- #
def _round_up(x, m):
    return -(-x // m) * m


def _phys_vmem_bytes():
    """Physical VMEM per TensorCore (128 MiB v5e/v6e, 64 MiB v7x)."""
    try:
        return int(pltpu.get_tpu_info().vmem_capacity_bytes)
    except Exception:
        return 64 << 20  # conservative fallback (v7x)


def _num_tensorcores():
    """TensorCores sharing the 'parallel' grid axis (v7x: 2, else 1)."""
    try:
        info = pltpu.get_tpu_info()
        for attr in ("num_cores", "core_count", "num_tensorcores"):
            v = getattr(info, attr, None)
            if v and 1 <= int(v) <= 4:
                return int(v)
    except Exception:
        pass
    try:
        kind = jax.devices()[0].device_kind.lower()
        if "v7" in kind or "7x" in kind:
            return 2
    except Exception:
        pass
    return 1


# ----------------------------- Pallas kernel ------------------------------ #
def _cconv_matmul_kernel(p_ref, w_ref, b_ref, out_ref):
    # p: (tm, 2K) bf16, w: (2K, CoutL) bf16, b: (1, CoutL) f32
    acc = jnp.dot(p_ref[...], w_ref[...], preferred_element_type=jnp.float32)
    out_ref[...] = (acc + b_ref[...]).astype(out_ref.dtype)


def _pick_tm(m_rows, row_in_bytes, row_out_bytes, resident_bytes, budget,
             num_tc, tm_max=512):
    """Largest M-tile (multiple of 8, <= tm_max) fitting the VMEM budget.

    Single-TC chips (v5e/v6e): never force a grid split (per-step overhead
    only).  Multi-TC chips (v7x): prefer the largest tm whose block count is
    a multiple of the core count so the 'parallel' axis shards evenly.
    """
    tm = min(tm_max, _round_up(max(m_rows, 8), 8))

    def fits(t):
        # p tile + out tile double-buffered, plus resident weight/bias bufs.
        return 2 * t * (row_in_bytes + row_out_bytes) + resident_bytes <= budget

    while tm > 8 and not fits(tm):
        tm = max(8, tm // 2)

    if num_tc > 1:
        t = tm
        while t >= 8:
            if pl.cdiv(m_rows, t) % num_tc == 0:
                return t
            t //= 2
    return tm


def _cconv_matmul(p, w, bias, out_dtype):
    """p: (M, 2K), w: (2K, CoutL), bias: (1, CoutL) -> (nblk*tm, CoutL)."""
    m_rows, k2 = p.shape
    coutl = w.shape[1]

    phys = _phys_vmem_bytes()
    num_tc = _num_tensorcores()
    budget = max(8 << 20, min(phys // 2, 48 << 20))       # tile+weight target
    vmem_limit = int(min(phys, budget + (16 << 20)))      # explicit scoped cap

    out_itemsize = jnp.dtype(out_dtype).itemsize
    # Constant-index weight/bias blocks are still double-buffered by the
    # BlockSpec pipeline -> count them twice in the footprint.
    resident = 2 * (k2 * coutl * w.dtype.itemsize + coutl * 4)
    tm = _pick_tm(m_rows, k2 * p.dtype.itemsize, coutl * out_itemsize,
                  resident, budget, num_tc)

    nblk = pl.cdiv(m_rows, tm)
    mp = nblk * tm
    if mp != m_rows:
        # Zero-pad the tail so the last block never reads out of bounds.
        p = jnp.pad(p, ((0, mp - m_rows), (0, 0)))

    cost = pl.CostEstimate(
        flops=2 * m_rows * k2 * coutl,
        transcendentals=0,
        bytes_accessed=(mp * k2 * p.dtype.itemsize
                        + k2 * coutl * w.dtype.itemsize
                        + coutl * 4
                        + mp * coutl * out_itemsize),
    )

    return pl.pallas_call(
        _cconv_matmul_kernel,
        out_shape=jax.ShapeDtypeStruct((mp, coutl), out_dtype),
        grid=(nblk,),
        in_specs=[
            pl.BlockSpec((tm, k2), lambda i: (i, 0)),
            pl.BlockSpec((k2, coutl), lambda i: (0, 0)),
            pl.BlockSpec((1, coutl), lambda i: (0, 0)),
        ],
        out_specs=pl.BlockSpec((tm, coutl), lambda i: (i, 0)),
        compiler_params=pltpu.CompilerParams(
            dimension_semantics=("parallel",),
            vmem_limit_bytes=vmem_limit),
        cost_estimate=cost,
    )(p, w, bias)


# ------------------------------- JAX glue ---------------------------------- #
def _im2col_nhwc(x_nhwc, k, stride, pad):
    """(N, H, W, C) -> patches (N*Ho*Wo, k*k*C), feature order (kh, kw, C).

    The k*k shifted windows are concatenated along the trailing axis, so the
    k^2-inflated data is written directly in its final row-major layout --
    no transpose / relayout of the inflated tensor.
    """
    n, h, w, c = x_nhwc.shape
    xp = jnp.pad(x_nhwc, ((0, 0), (pad, pad), (pad, pad), (0, 0)))
    ho = (h + 2 * pad - k) // stride + 1
    wo = (w + 2 * pad - k) // stride + 1
    cols = [xp[:, dh:dh + stride * ho:stride, dw:dw + stride * wo:stride, :]
            for dh in range(k) for dw in range(k)]        # each (N, Ho, Wo, C)
    patches = jnp.concatenate(cols, axis=-1)              # (N, Ho, Wo, k*k*C)
    return patches.reshape(n * ho * wo, k * k * c), ho, wo


def _complex_conv2d_forward(x, w_fused, bias, *, k, stride, pad, cout,
                            compute_dtype):
    n = x.shape[0]
    # Channel-concat real/imag BEFORE the k^2 inflation (cheap) and move to
    # NHWC once, so im2col needs no post-inflation relayout.
    xc = jnp.concatenate([jnp.real(x), jnp.imag(x)], axis=1)   # (N, 2Cin, H, W)
    xc = xc.transpose(0, 2, 3, 1).astype(compute_dtype)        # (N, H, W, 2Cin)
    p, ho, wo = _im2col_nhwc(xc, k, stride, pad)               # (M, 2K)
    m_rows = p.shape[0]

    out = _cconv_matmul(p, w_fused, bias, out_dtype=compute_dtype)

    yr = out[:m_rows, :cout].astype(jnp.float32)
    yi = out[:m_rows, cout:2 * cout].astype(jnp.float32)
    yr = yr.reshape(n, ho, wo, cout).transpose(0, 3, 1, 2)
    yi = yi.reshape(n, ho, wo, cout).transpose(0, 3, 1, 2)
    # TODO(synk): if downstream accepts NHWC, drop the transposes above.
    return lax.complex(yr, yi)


class ComplexConv2dPallas:
    """Pallas/JAX equivalent of the PyTorch ComplexConv2d module."""

    def __init__(self, in_channels, out_channels, kernel_size, stride, padding,
                 key=None, compute_dtype=jnp.bfloat16, pad_output_lanes=None):
        if key is None:
            key = jax.random.PRNGKey(0)
        self.cin, self.cout = in_channels, out_channels
        self.k, self.s, self.p = kernel_size, stride, padding
        self.compute_dtype = compute_dtype

        kwr, kwi, kbr, kbi = jax.random.split(key, 4)
        fan_in = in_channels * kernel_size * kernel_size
        bound = 1.0 / float(jnp.sqrt(fan_in))
        shp = (out_channels, in_channels, kernel_size, kernel_size)
        # Deterministic init mimicking nn.Conv2d's uniform(-bound, bound).
        self.w_r = jax.random.uniform(kwr, shp, jnp.float32, -bound, bound)
        self.w_i = jax.random.uniform(kwi, shp, jnp.float32, -bound, bound)
        self.b_r = jax.random.uniform(kbr, (out_channels,), jnp.float32,
                                      -bound, bound)
        self.b_i = jax.random.uniform(kbi, (out_channels,), jnp.float32,
                                      -bound, bound)

        # Fused weight: row order (kh, kw, [real chans | imag chans]) matches
        # the im2col rows; columns are [yr | yi]:
        #   out = p @ [[Wr, Wi], [-Wi, Wr]] + [b_r - b_i | b_r + b_i]
        wr = self.w_r.transpose(2, 3, 1, 0)                 # (kh, kw, Cin, Cout)
        wi = self.w_i.transpose(2, 3, 1, 0)
        w_real_rows = jnp.concatenate([wr, wi], axis=-1)    # xr coefficients
        w_imag_rows = jnp.concatenate([-wi, wr], axis=-1)   # xi coefficients
        w_fused = jnp.concatenate([w_real_rows, w_imag_rows], axis=2)
        w_fused = w_fused.reshape(2 * fan_in, 2 * out_channels)
        bias = jnp.concatenate([self.b_r - self.b_i, self.b_r + self.b_i])

        two_cout = 2 * out_channels
        if pad_output_lanes is None:
            # For small Cout an unpadded output (masked stores) writes far
            # fewer HBM bytes than a 128-lane zero-padded slab; pad only once
            # 2*Cout already reaches a full lane width.
            pad_output_lanes = two_cout >= 128
        self.coutl = _round_up(two_cout, 128) if pad_output_lanes else two_cout
        pad_c = self.coutl - two_cout
        self.w_fused = jnp.pad(w_fused, ((0, 0), (0, pad_c))).astype(compute_dtype)
        self.biasp = jnp.pad(bias, (0, pad_c)).reshape(1, self.coutl).astype(jnp.float32)

        # One jit over im2col + kernel + output relayout so the wrapper
        # copies fuse with the surrounding ops.
        self._fwd = jax.jit(functools.partial(
            _complex_conv2d_forward, k=self.k, stride=self.s, pad=self.p,
            cout=self.cout, compute_dtype=compute_dtype))

    def __call__(self, x):
        # x: complex64, (N, Cin, H, W)
        return self._fwd(x, self.w_fused, self.biasp)


# ------------------------------ reference ---------------------------------- #
def _ref_forward(mod, x):
    def conv(z, w, b):
        y = lax.conv_general_dilated(
            z, w, window_strides=(mod.s, mod.s),
            padding=[(mod.p, mod.p), (mod.p, mod.p)],
            dimension_numbers=('NCHW', 'OIHW', 'NCHW'))
        return y + b[None, :, None, None]
    xr, xi = jnp.real(x), jnp.imag(x)
    yr = conv(xr, mod.w_r, mod.b_r) - conv(xi, mod.w_i, mod.b_i)
    yi = conv(xr, mod.w_i, mod.b_i) + conv(xi, mod.w_r, mod.b_r)
    return lax.complex(yr, yi)


if __name__ == "__main__":
    key = jax.random.PRNGKey(0)
    kx_r, kx_i, kparams = jax.random.split(key, 3)

    N, Cin, Cout, H, W = 2, 4, 8, 16, 16
    ksize, stride, padding = 3, 1, 1

    xr = jax.random.normal(kx_r, (N, Cin, H, W), jnp.float32)
    xi = jax.random.normal(kx_i, (N, Cin, H, W), jnp.float32)
    x = lax.complex(xr, xi)

    mod = ComplexConv2dPallas(Cin, Cout, ksize, stride, padding, key=kparams)

    y = jax.block_until_ready(mod(x))
    y_ref = jax.block_until_ready(_ref_forward(mod, x))

    assert y.shape == (N, Cout, H, W) and y.dtype == jnp.complex64
    # bf16 inputs/weights/output with f32 accumulation: expected max abs
    # error ~1e-2..2e-2 at these magnitudes (previous f32-output version
    # passed at 3e-2; bf16 output adds <= ~0.2% relative).
    tol = 5e-2 if mod.compute_dtype == jnp.bfloat16 else 1e-4
    assert jnp.allclose(y, y_ref, atol=tol, rtol=tol)
    print("KERNEL_OK")
</pallas_src>

<mosaic_0001>
module attributes {stable_mosaic.version = 11 : i64} {
  func.func @_cconv_matmul_kernel(%arg0: i32, %arg1: memref<512x72xbf16, #tpu.memory_space<vmem>>, %arg2: memref<72x16xbf16, #tpu.memory_space<vmem>>, %arg3: memref<1x16xf32, #tpu.memory_space<vmem>>, %arg4: memref<512x16xbf16, #tpu.memory_space<vmem>>) attributes {dimension_semantics = [#tpu.dimension_semantics<parallel>], iteration_bounds = array<i64: 1>, scalar_prefetch = 0 : i64, scratch_operands = 0 : i64, tpu.core_type = #tpu.core_type<tc>, window_params = [{transform_indices = @transform_0, window_bounds = array<i64: 512, 72>}, {pipeline_mode = #tpu.pipeline_mode<synchronous>, transform_indices = @transform_1, window_bounds = array<i64: 72, 16>}, {pipeline_mode = #tpu.pipeline_mode<synchronous>, transform_indices = @transform_2, window_bounds = array<i64: 1, 16>}, {transform_indices = @transform_3, window_bounds = array<i64: 512, 16>}]} {
    %c0 = arith.constant 0 : index
    %c0_0 = arith.constant 0 : index
    %0 = vector.load %arg1[%c0, %c0_0] : memref<512x72xbf16, #tpu.memory_space<vmem>>, vector<512x72xbf16>
    %c0_1 = arith.constant 0 : index
    %c0_2 = arith.constant 0 : index
    %1 = vector.load %arg2[%c0_1, %c0_2] : memref<72x16xbf16, #tpu.memory_space<vmem>>, vector<72x16xbf16>
    %cst = arith.constant dense<0.000000e+00> : vector<512x16xf32>
    %2 = tpu.matmul %0, %1, %cst {dimension_numbers = #tpu.dot_dimension_numbers<[1], [0], [0], [1], [0, 0, 1, 1], [], []>} : vector<512x72xbf16>, vector<72x16xbf16>, vector<512x16xf32> -> vector<512x16xf32>
    %c0_3 = arith.constant 0 : index
    %c0_4 = arith.constant 0 : index
    %3 = vector.load %arg3[%c0_3, %c0_4] : memref<1x16xf32, #tpu.memory_space<vmem>>, vector<1x16xf32>
    %4 = vector.broadcast %3 : vector<1x16xf32> to vector<512x16xf32>
    %5 = arith.addf %2, %4 : vector<512x16xf32>
    %6 = arith.truncf %5 : vector<512x16xf32> to vector<512x16xbf16>
    %c0_5 = arith.constant 0 : index
    %c0_6 = arith.constant 0 : index
    %7 = vector.load %arg4[%c0_5, %c0_6] : memref<512x16xbf16, #tpu.memory_space<vmem>>, vector<512x16xbf16>
    tpu.vector_store %arg4[%c0_5, %c0_6], %6 {strides = array<i32>} : memref<512x16xbf16, #tpu.memory_space<vmem>>, vector<512x16xbf16>,
    return
  }
  func.func @transform_0(%arg0: i32) -> (i32, i32) {
    %c0_i32 = arith.constant 0 : i32
    %c0_i32_0 = arith.constant 0 : i32
    return %arg0, %c0_i32 : i32, i32
  }
  func.func @transform_1(%arg0: i32) -> (i32, i32) {
    %c0_i32 = arith.constant 0 : i32
    %c0_i32_0 = arith.constant 0 : i32
    %c0_i32_1 = arith.constant 0 : i32
    return %c0_i32, %c0_i32_0 : i32, i32
  }
  func.func @transform_2(%arg0: i32) -> (i32, i32) {
    %c0_i32 = arith.constant 0 : i32
    %c0_i32_0 = arith.constant 0 : i32
    %c0_i32_1 = arith.constant 0 : i32
    return %c0_i32, %c0_i32_0 : i32, i32
  }
  func.func @transform_3(%arg0: i32) -> (i32, i32) {
    %c0_i32 = arith.constant 0 : i32
    %c0_i32_0 = arith.constant 0 : i32
    return %arg0, %c0_i32 : i32, i32
  }
}

</mosaic_0001>

<bundles_post_ra>
// kernel: custom-call.1
= control target key start
LH: loop header
LB: loop body
LE: loop exit
PB: predicated region body
PF: predicated region fallthrough
CT: control target
= control target key end

     0   :  { %s841_s0 = inlined_call_operand.vmem [shape: c64[2,4,16,16], index: 0, kind: input, shape index: {}]   ;;  %s842_s1 = inlined_call_operand.vmem [shape: f32[2,4,16,16], index: 1, kind: output, shape index: {}]  }
   0x1   :  { %v320_v0 = vld [vmem:[%s841_s0 + $0x200] sm:$0xff]  ;;  %v321_v1 = vld [vmem:[%s841_s0 + $0x208] sm:$0xff]  ;;  %v323_v2 = vld [vmem:[%s841_s0 + $0x210] sm:$0xff] }
   0x2   :  { %4 = vst [vmem:[%s842_s1] sm:$0xff] %v320_v0  ;;  %v325_v3 = vld [vmem:[%s841_s0 + $0x218] sm:$0xff]  ;;  %v327_v4 = vld [vmem:[%s841_s0 + $0x220] sm:$0xff]  ;;  %v329_v5 = vld [vmem:[%s841_s0 + $0x228] sm:$0xff] }
   0x3   :  { %322 = vst [vmem:[%s842_s1 + $0x8] sm:$0xff] %v321_v1  ;;  %v331_v6 = vld [vmem:[%s841_s0 + $0x230] sm:$0xff]  ;;  %v333_v7 = vld [vmem:[%s841_s0 + $0x238] sm:$0xff]  ;;  %v335_v8 = vld [vmem:[%s841_s0 + $0x240] sm:$0xff] }
   0x4   :  { %324 = vst [vmem:[%s842_s1 + $0x10] sm:$0xff] %v323_v2  ;;  %v337_v9 = vld [vmem:[%s841_s0 + $0x248] sm:$0xff]  ;;  %v339_v10 = vld [vmem:[%s841_s0 + $0x250] sm:$0xff]  ;;  %v341_v11 = vld [vmem:[%s841_s0 + $0x258] sm:$0xff] }
   0x5   :  { %326 = vst [vmem:[%s842_s1 + $0x18] sm:$0xff] %v325_v3  ;;  %v343_v12 = vld [vmem:[%s841_s0 + $0x260] sm:$0xff]  ;;  %v345_v13 = vld [vmem:[%s841_s0 + $0x268] sm:$0xff]  ;;  %v347_v14 = vld [vmem:[%s841_s0 + $0x270] sm:$0xff] }
   0x6   :  { %328 = vst [vmem:[%s842_s1 + $0x20] sm:$0xff] %v327_v4  ;;  %v349_v15 = vld [vmem:[%s841_s0 + $0x278] sm:$0xff]  ;;  %v351_v16 = vld [vmem:[%s841_s0 + $0x280] sm:$0xff]  ;;  %v353_v17 = vld [vmem:[%s841_s0 + $0x288] sm:$0xff] }
   0x7   :  { %330 = vst [vmem:[%s842_s1 + $0x28] sm:$0xff] %v329_v5  ;;  %v355_v18 = vld [vmem:[%s841_s0 + $0x290] sm:$0xff]  ;;  %v357_v19 = vld [vmem:[%s841_s0 + $0x298] sm:$0xff]  ;;  %v359_v20 = vld [vmem:[%s841_s0 + $0x2a0] sm:$0xff] }
   0x8   :  { %332 = vst [vmem:[%s842_s1 + $0x30] sm:$0xff] %v331_v6  ;;  %v361_v21 = vld [vmem:[%s841_s0 + $0x2a8] sm:$0xff]  ;;  %v363_v22 = vld [vmem:[%s841_s0 + $0x2b0] sm:$0xff]  ;;  %v365_v23 = vld [vmem:[%s841_s0 + $0x2b8] sm:$0xff] }
   0x9   :  { %334 = vst [vmem:[%s842_s1 + $0x38] sm:$0xff] %v333_v7  ;;  %v367_v24 = vld [vmem:[%s841_s0 + $0x2c0] sm:$0xff]  ;;  %v369_v25 = vld [vmem:[%s841_s0 + $0x2c8] sm:$0xff]  ;;  %v371_v26 = vld [vmem:[%s841_s0 + $0x2d0] sm:$0xff] }
   0xa   :  { %336 = vst [vmem:[%s842_s1 + $0x40] sm:$0xff] %v335_v8  ;;  %v373_v27 = vld [vmem:[%s841_s0 + $0x2d8] sm:$0xff]  ;;  %v375_v28 = vld [vmem:[%s841_s0 + $0x2e0] sm:$0xff]  ;;  %v377_v29 = vld [vmem:[%s841_s0 + $0x2e8] sm:$0xff] }
   0xb   :  { %338 = vst [vmem:[%s842_s1 + $0x48] sm:$0xff] %v337_v9  ;;  %v379_v30 = vld [vmem:[%s841_s0 + $0x2f0] sm:$0xff]  ;;  %v381_v31 = vld [vmem:[%s841_s0 + $0x2f8] sm:$0xff]  ;;  %v383_v32 = vld [vmem:[%s841_s0 + $0x300] sm:$0xff] }
   0xc   :  { %340 = vst [vmem:[%s842_s1 + $0x50] sm:$0xff] %v339_v10  ;;  %v385_v33 = vld [vmem:[%s841_s0 + $0x308] sm:$0xff]  ;;  %v387_v34 = vld [vmem:[%s841_s0 + $0x310] sm:$0xff]  ;;  %v389_v35 = vld [vmem:[%s841_s0 + $0x318] sm:$0xff] }
   0xd   :  { %342 = vst [vmem:[%s842_s1 + $0x58] sm:$0xff] %v341_v11  ;;  %v391_v36 = vld [vmem:[%s841_s0 + $0x320] sm:$0xff]  ;;  %v393_v37 = vld [vmem:[%s841_s0 + $0x328] sm:$0xff]  ;;  %v395_v38 = vld [vmem:[%s841_s0 + $0x330] sm:$0xff] }
   0xe   :  { %344 = vst [vmem:[%s842_s1 + $0x60] sm:$0xff] %v343_v12  ;;  %v397_v39 = vld [vmem:[%s841_s0 + $0x338] sm:$0xff]  ;;  %v399_v40 = vld [vmem:[%s841_s0 + $0x340] sm:$0xff]  ;;  %v401_v41 = vld [vmem:[%s841_s0 + $0x348] sm:$0xff] }
   0xf   :  { %346 = vst [vmem:[%s842_s1 + $0x68] sm:$0xff] %v345_v13  ;;  %v403_v42 = vld [vmem:[%s841_s0 + $0x350] sm:$0xff]  ;;  %v405_v43 = vld [vmem:[%s841_s0 + $0x358] sm:$0xff]  ;;  %v407_v44 = vld [vmem:[%s841_s0 + $0x360] sm:$0xff] }
  0x10   :  { %348 = vst [vmem:[%s842_s1 + $0x70] sm:$0xff] %v347_v14  ;;  %v409_v45 = vld [vmem:[%s841_s0 + $0x368] sm:$0xff]  ;;  %v411_v46 = vld [vmem:[%s841_s0 + $0x370] sm:$0xff]  ;;  %v413_v47 = vld [vmem:[%s841_s0 + $0x378] sm:$0xff] }
  0x11   :  { %350 = vst [vmem:[%s842_s1 + $0x78] sm:$0xff] %v349_v15  ;;  %v415_v48 = vld [vmem:[%s841_s0 + $0x380] sm:$0xff]  ;;  %v417_v49 = vld [vmem:[%s841_s0 + $0x388] sm:$0xff]  ;;  %v419_v50 = vld [vmem:[%s841_s0 + $0x390] sm:$0xff] }
  0x12   :  { %352 = vst [vmem:[%s842_s1 + $0x80] sm:$0xff] %v351_v16  ;;  %v421_v51 = vld [vmem:[%s841_s0 + $0x398] sm:$0xff]  ;;  %v423_v52 = vld [vmem:[%s841_s0 + $0x3a0] sm:$0xff]  ;;  %v425_v53 = vld [vmem:[%s841_s0 + $0x3a8] sm:$0xff] }
  0x13   :  { %354 = vst [vmem:[%s842_s1 + $0x88] sm:$0xff] %v353_v17  ;;  %v427_v54 = vld [vmem:[%s841_s0 + $0x3b0] sm:$0xff]  ;;  %v429_v55 = vld [vmem:[%s841_s0 + $0x3b8] sm:$0xff]  ;;  %v431_v56 = vld [vmem:[%s841_s0 + $0x3c0] sm:$0xff] }
  0x14   :  { %356 = vst [vmem:[%s842_s1 + $0x90] sm:$0xff] %v355_v18  ;;  %v433_v57 = vld [vmem:[%s841_s0 + $0x3c8] sm:$0xff]  ;;  %v435_v58 = vld [vmem:[%s841_s0 + $0x3d0] sm:$0xff]  ;;  %v437_v59 = vld [vmem:[%s841_s0 + $0x3d8] sm:$0xff] }
  0x15   :  { %358 = vst [vmem:[%s842_s1 + $0x98] sm:$0xff] %v357_v19  ;;  %v439_v60 = vld [vmem:[%s841_s0 + $0x3e0] sm:$0xff]  ;;  %v441_v61 = vld [vmem:[%s841_s0 + $0x3e8] sm:$0xff]  ;;  %v443_v62 = vld [vmem:[%s841_s0 + $0x3f0] sm:$0xff] }
  0x16   :  { %360 = vst [vmem:[%s842_s1 + $0xa0] sm:$0xff] %v359_v20  ;;  %v445_v63 = vld [vmem:[%s841_s0 + $0x3f8] sm:$0xff] }
  0x17   :  { %362 = vst [vmem:[%s842_s1 + $0xa8] sm:$0xff] %v361_v21 }
  0x18   :  { %364 = vst [vmem:[%s842_s1 + $0xb0] sm:$0xff] %v363_v22 }
  0x19   :  { %366 = vst [vmem:[%s842_s1 + $0xb8] sm:$0xff] %v365_v23 }
  0x1a   :  { %368 = vst [vmem:[%s842_s1 + $0xc0] sm:$0xff] %v367_v24 }
  0x1b   :  { %370 = vst [vmem:[%s842_s1 + $0xc8] sm:$0xff] %v369_v25 }
  0x1c   :  { %372 = vst [vmem:[%s842_s1 + $0xd0] sm:$0xff] %v371_v26 }
  0x1d   :  { %374 = vst [vmem:[%s842_s1 + $0xd8] sm:$0xff] %v373_v27 }
  0x1e   :  { %376 = vst [vmem:[%s842_s1 + $0xe0] sm:$0xff] %v375_v28 }
  0x1f   :  { %378 = vst [vmem:[%s842_s1 + $0xe8] sm:$0xff] %v377_v29 }
  0x20   :  { %380 = vst [vmem:[%s842_s1 + $0xf0] sm:$0xff] %v379_v30 }
  0x21   :  { %382 = vst [vmem:[%s842_s1 + $0xf8] sm:$0xff] %v381_v31 }
  0x22   :  { %384 = vst [vmem:[%s842_s1 + $0x100] sm:$0xff] %v383_v32 }
  0x23   :  { %386 = vst [vmem:[%s842_s1 + $0x108] sm:$0xff] %v385_v33 }
  0x24   :  { %388 = vst [vmem:[%s842_s1 + $0x110] sm:$0xff] %v387_v34 }
  0x25   :  { %390 = vst [vmem:[%s842_s1 + $0x118] sm:$0xff] %v389_v35 }
  0x26   :  { %392 = vst [vmem:[%s842_s1 + $0x120] sm:$0xff] %v391_v36 }
  0x27   :  { %394 = vst [vmem:[%s842_s1 + $0x128] sm:$0xff] %v393_v37 }
  0x28   :  { %396 = vst [vmem:[%s842_s1 + $0x130] sm:$0xff] %v395_v38 }
  0x29   :  { %398 = vst [vmem:[%s842_s1 + $0x138] sm:$0xff] %v397_v39 }
  0x2a   :  { %400 = vst [vmem:[%s842_s1 + $0x140] sm:$0xff] %v399_v40 }
  0x2b   :  { %402 = vst [vmem:[%s842_s1 + $0x148] sm:$0xff] %v401_v41 }
  0x2c   :  { %404 = vst [vmem:[%s842_s1 + $0x150] sm:$0xff] %v403_v42 }
  0x2d   :  { %406 = vst [vmem:[%s842_s1 + $0x158] sm:$0xff] %v405_v43 }
  0x2e   :  { %408 = vst [vmem:[%s842_s1 + $0x160] sm:$0xff] %v407_v44 }
  0x2f   :  { %410 = vst [vmem:[%s842_s1 + $0x168] sm:$0xff] %v409_v45 }
  0x30   :  { %412 = vst [vmem:[%s842_s1 + $0x170] sm:$0xff] %v411_v46 }
  0x31   :  { %414 = vst [vmem:[%s842_s1 + $0x178] sm:$0xff] %v413_v47 }
  0x32   :  { %416 = vst [vmem:[%s842_s1 + $0x180] sm:$0xff] %v415_v48 }
  0x33   :  { %418 = vst [vmem:[%s842_s1 + $0x188] sm:$0xff] %v417_v49 }
  0x34   :  { %420 = vst [vmem:[%s842_s1 + $0x190] sm:$0xff] %v419_v50 }
  0x35   :  { %422 = vst [vmem:[%s842_s1 + $0x198] sm:$0xff] %v421_v51 }
  0x36   :  { %424 = vst [vmem:[%s842_s1 + $0x1a0] sm:$0xff] %v423_v52 }
  0x37   :  { %426 = vst [vmem:[%s842_s1 + $0x1a8] sm:$0xff] %v425_v53 }
  0x38   :  { %428 = vst [vmem:[%s842_s1 + $0x1b0] sm:$0xff] %v427_v54 }
  0x39   :  { %430 = vst [vmem:[%s842_s1 + $0x1b8] sm:$0xff] %v429_v55 }
  0x3a   :  { %432 = vst [vmem:[%s842_s1 + $0x1c0] sm:$0xff] %v431_v56 }
  0x3b   :  { %434 = vst [vmem:[%s842_s1 + $0x1c8] sm:$0xff] %v433_v57 }
  0x3c   :  { %436 = vst [vmem:[%s842_s1 + $0x1d0] sm:$0xff] %v435_v58 }
  0x3d   :  { %438 = vst [vmem:[%s842_s1 + $0x1d8] sm:$0xff] %v437_v59 }
  0x3e   :  { %440 = vst [vmem:[%s842_s1 + $0x1e0] sm:$0xff] %v439_v60 }
  0x3f   :  { %442 = vst [vmem:[%s842_s1 + $0x1e8] sm:$0xff] %v441_v61 }
  0x40   :  { %444 = vst [vmem:[%s842_s1 + $0x1f0] sm:$0xff] %v443_v62 }
  0x41   :  { %446 = vst [vmem:[%s842_s1 + $0x1f8] sm:$0xff] %v445_v63 }

// kernel: custom-call
= control target key start
LH: loop header
LB: loop body
LE: loop exit
PB: predicated region body
PF: predicated region fallthrough
CT: control target
= control target key end

     0   :  { %s776_s0 = inlined_call_operand.vmem [shape: c64[2,4,16,16], index: 0, kind: input, shape index: {}]   ;;  %s777_s1 = inlined_call_operand.vmem [shape: f32[2,4,16,16], index: 1, kind: output, shape index: {}]  }
   0x1   :  { %v2_v0 = vld [vmem:[%s776_s0] sm:$0xff]  ;;  %v256_v1 = vld [vmem:[%s776_s0 + $0x8] sm:$0xff]  ;;  %v258_v2 = vld [vmem:[%s776_s0 + $0x10] sm:$0xff] }
   0x2   :  { %3 = vst [vmem:[%s777_s1] sm:$0xff] %v2_v0  ;;  %v260_v3 = vld [vmem:[%s776_s0 + $0x18] sm:$0xff]  ;;  %v262_v4 = vld [vmem:[%s776_s0 + $0x20] sm:$0xff]  ;;  %v264_v5 = vld [vmem:[%s776_s0 + $0x28] sm:$0xff] }
   0x3   :  { %257 = vst [vmem:[%s777_s1 + $0x8] sm:$0xff] %v256_v1  ;;  %v266_v6 = vld [vmem:[%s776_s0 + $0x30] sm:$0xff]  ;;  %v268_v7 = vld [vmem:[%s776_s0 + $0x38] sm:$0xff]  ;;  %v270_v8 = vld [vmem:[%s776_s0 + $0x40] sm:$0xff] }
   0x4   :  { %259 = vst [vmem:[%s777_s1 + $0x10] sm:$0xff] %v258_v2  ;;  %v272_v9 = vld [vmem:[%s776_s0 + $0x48] sm:$0xff]  ;;  %v274_v10 = vld [vmem:[%s776_s0 + $0x50] sm:$0xff]  ;;  %v276_v11 = vld [vmem:[%s776_s0 + $0x58] sm:$0xff] }
   0x5   :  { %261 = vst [vmem:[%s777_s1 + $0x18] sm:$0xff] %v260_v3  ;;  %v278_v12 = vld [vmem:[%s776_s0 + $0x60] sm:$0xff]  ;;  %v280_v13 = vld [vmem:[%s776_s0 + $0x68] sm:$0xff]  ;;  %v282_v14 = vld [vmem:[%s776_s0 + $0x70] sm:$0xff] }
   0x6   :  { %263 = vst [vmem:[%s777_s1 + $0x20] sm:$0xff] %v262_v4  ;;  %v284_v15 = vld [vmem:[%s776_s0 + $0x78] sm:$0xff]  ;;  %v286_v16 = vld [vmem:[%s776_s0 + $0x80] sm:$0xff]  ;;  %v288_v17 = vld [vmem:[%s776_s0 + $0x88] sm:$0xff] }
   0x7   :  { %265 = vst [vmem:[%s777_s1 + $0x28] sm:$0xff] %v264_v5  ;;  %v290_v18 = vld [vmem:[%s776_s0 + $0x90] sm:$0xff]  ;;  %v292_v19 = vld [vmem:[%s776_s0 + $0x98] sm:$0xff]  ;;  %v294_v20 = vld [vmem:[%s776_s0 + $0xa0] sm:$0xff] }
   0x8   :  { %267 = vst [vmem:[%s777_s1 + $0x30] sm:$0xff] %v266_v6  ;;  %v296_v21 = vld [vmem:[%s776_s0 + $0xa8] sm:$0xff]  ;;  %v298_v22 = vld [vmem:[%s776_s0 + $0xb0] sm:$0xff]  ;;  %v300_v23 = vld [vmem:[%s776_s0 + $0xb8] sm:$0xff] }
   0x9   :  { %269 = vst [vmem:[%s777_s1 + $0x38] sm:$0xff] %v268_v7  ;;  %v302_v24 = vld [vmem:[%s776_s0 + $0xc0] sm:$0xff]  ;;  %v304_v25 = vld [vmem:[%s776_s0 + $0xc8] sm:$0xff]  ;;  %v306_v26 = vld [vmem:[%s776_s0 + $0xd0] sm:$0xff] }
   0xa   :  { %271 = vst [vmem:[%s777_s1 + $0x40] sm:$0xff] %v270_v8  ;;  %v308_v27 = vld [vmem:[%s776_s0 + $0xd8] sm:$0xff]  ;;  %v310_v28 = vld [vmem:[%s776_s0 + $0xe0] sm:$0xff]  ;;  %v312_v29 = vld [vmem:[%s776_s0 + $0xe8] sm:$0xff] }
   0xb   :  { %273 = vst [vmem:[%s777_s1 + $0x48] sm:$0xff] %v272_v9  ;;  %v314_v30 = vld [vmem:[%s776_s0 + $0xf0] sm:$0xff]  ;;  %v316_v31 = vld [vmem:[%s776_s0 + $0xf8] sm:$0xff]  ;;  %v318_v32 = vld [vmem:[%s776_s0 + $0x100] sm:$0xff] }
   0xc   :  { %275 = vst [vmem:[%s777_s1 + $0x50] sm:$0xff] %v274_v10  ;;  %v320_v33 = vld [vmem:[%s776_s0 + $0x108] sm:$0xff]  ;;  %v322_v34 = vld [vmem:[%s776_s0 + $0x110] sm:$0xff]  ;;  %v324_v35 = vld [vmem:[%s776_s0 + $0x118] sm:$0xff] }
   0xd   :  { %277 = vst [vmem:[%s777_s1 + $0x58] sm:$0xff] %v276_v11  ;;  %v326_v36 = vld [vmem:[%s776_s0 + $0x120] sm:$0xff]  ;;  %v328_v37 = vld [vmem:[%s776_s0 + $0x128] sm:$0xff]  ;;  %v330_v38 = vld [vmem:[%s776_s0 + $0x130] sm:$0xff] }
   0xe   :  { %279 = vst [vmem:[%s777_s1 + $0x60] sm:$0xff] %v278_v12  ;;  %v332_v39 = vld [vmem:[%s776_s0 + $0x138] sm:$0xff]  ;;  %v334_v40 = vld [vmem:[%s776_s0 + $0x140] sm:$0xff]  ;;  %v336_v41 = vld [vmem:[%s776_s0 + $0x148] sm:$0xff] }
   0xf   :  { %281 = vst [vmem:[%s777_s1 + $0x68] sm:$0xff] %v280_v13  ;;  %v338_v42 = vld [vmem:[%s776_s0 + $0x150] sm:$0xff]  ;;  %v340_v43 = vld [vmem:[%s776_s0 + $0x158] sm:$0xff]  ;;  %v342_v44 = vld [vmem:[%s776_s0 + $0x160] sm:$0xff] }
  0x10   :  { %283 = vst [vmem:[%s777_s1 + $0x70] sm:$0xff] %v282_v14  ;;  %v344_v45 = vld [vmem:[%s776_s0 + $0x168] sm:$0xff]  ;;  %v346_v46 = vld [vmem:[%s776_s0 + $0x170] sm:$0xff]  ;;  %v348_v47 = vld [vmem:[%s776_s0 + $0x178] sm:$0xff] }
  0x11   :  { %285 = vst [vmem:[%s777_s1 + $0x78] sm:$0xff] %v284_v15  ;;  %v350_v48 = vld [vmem:[%s776_s0 + $0x180] sm:$0xff]  ;;  %v352_v49 = vld [vmem:[%s776_s0 + $0x188] sm:$0xff]  ;;  %v354_v50 = vld [vmem:[%s776_s0 + $0x190] sm:$0xff] }
  0x12   :  { %287 = vst [vmem:[%s777_s1 + $0x80] sm:$0xff] %v286_v16  ;;  %v356_v51 = vld [vmem:[%s776_s0 + $0x198] sm:$0xff]  ;;  %v358_v52 = vld [vmem:[%s776_s0 + $0x1a0] sm:$0xff]  ;;  %v360_v53 = vld [vmem:[%s776_s0 + $0x1a8] sm:$0xff] }
  0x13   :  { %289 = vst [vmem:[%s777_s1 + $0x88] sm:$0xff] %v288_v17  ;;  %v362_v54 = vld [vmem:[%s776_s0 + $0x1b0] sm:$0xff]  ;;  %v364_v55 = vld [vmem:[%s776_s0 + $0x1b8] sm:$0xff]  ;;  %v366_v56 = vld [vmem:[%s776_s0 + $0x1c0] sm:$0xff] }
  0x14   :  { %291 = vst [vmem:[%s777_s1 + $0x90] sm:$0xff] %v290_v18  ;;  %v368_v57 = vld [vmem:[%s776_s0 + $0x1c8] sm:$0xff]  ;;  %v370_v58 = vld [vmem:[%s776_s0 + $0x1d0] sm:$0xff]  ;;  %v372_v59 = vld [vmem:[%s776_s0 + $0x1d8] sm:$0xff] }
  0x15   :  { %293 = vst [vmem:[%s777_s1 + $0x98] sm:$0xff] %v292_v19  ;;  %v374_v60 = vld [vmem:[%s776_s0 + $0x1e0] sm:$0xff]  ;;  %v376_v61 = vld [vmem:[%s776_s0 + $0x1e8] sm:$0xff]  ;;  %v378_v62 = vld [vmem:[%s776_s0 + $0x1f0] sm:$0xff] }
  0x16   :  { %295 = vst [vmem:[%s777_s1 + $0xa0] sm:$0xff] %v294_v20  ;;  %v380_v63 = vld [vmem:[%s776_s0 + $0x1f8] sm:$0xff] }
  0x17   :  { %297 = vst [vmem:[%s777_s1 + $0xa8] sm:$0xff] %v296_v21 }
  0x18   :  { %299 = vst [vmem:[%s777_s1 + $0xb0] sm:$0xff] %v298_v22 }
  0x19   :  { %301 = vst [vmem:[%s777_s1 + $0xb8] sm:$0xff] %v300_v23 }
  0x1a   :  { %303 = vst [vmem:[%s777_s1 + $0xc0] sm:$0xff] %v302_v24 }
  0x1b   :  { %305 = vst [vmem:[%s777_s1 + $0xc8] sm:$0xff] %v304_v25 }
  0x1c   :  { %307 = vst [vmem:[%s777_s1 + $0xd0] sm:$0xff] %v306_v26 }
  0x1d   :  { %309 = vst [vmem:[%s777_s1 + $0xd8] sm:$0xff] %v308_v27 }
  0x1e   :  { %311 = vst [vmem:[%s777_s1 + $0xe0] sm:$0xff] %v310_v28 }
  0x1f   :  { %313 = vst [vmem:[%s777_s1 + $0xe8] sm:$0xff] %v312_v29 }
  0x20   :  { %315 = vst [vmem:[%s777_s1 + $0xf0] sm:$0xff] %v314_v30 }
  0x21   :  { %317 = vst [vmem:[%s777_s1 + $0xf8] sm:$0xff] %v316_v31 }
  0x22   :  { %319 = vst [vmem:[%s777_s1 + $0x100] sm:$0xff] %v318_v32 }
  0x23   :  { %321 = vst [vmem:[%s777_s1 + $0x108] sm:$0xff] %v320_v33 }
  0x24   :  { %323 = vst [vmem:[%s777_s1 + $0x110] sm:$0xff] %v322_v34 }
  0x25   :  { %325 = vst [vmem:[%s777_s1 + $0x118] sm:$0xff] %v324_v35 }
  0x26   :  { %327 = vst [vmem:[%s777_s1 + $0x120] sm:$0xff] %v326_v36 }
  0x27   :  { %329 = vst [vmem:[%s777_s1 + $0x128] sm:$0xff] %v328_v37 }
  0x28   :  { %331 = vst [vmem:[%s777_s1 + $0x130] sm:$0xff] %v330_v38 }
  0x29   :  { %333 = vst [vmem:[%s777_s1 + $0x138] sm:$0xff] %v332_v39 }
  0x2a   :  { %335 = vst [vmem:[%s777_s1 + $0x140] sm:$0xff] %v334_v40 }
  0x2b   :  { %337 = vst [vmem:[%s777_s1 + $0x148] sm:$0xff] %v336_v41 }
  0x2c   :  { %339 = vst [vmem:[%s777_s1 + $0x150] sm:$0xff] %v338_v42 }
  0x2d   :  { %341 = vst [vmem:[%s777_s1 + $0x158] sm:$0xff] %v340_v43 }
  0x2e   :  { %343 = vst [vmem:[%s777_s1 + $0x160] sm:$0xff] %v342_v44 }
  0x2f   :  { %345 = vst [vmem:[%s777_s1 + $0x168] sm:$0xff] %v344_v45 }
  0x30   :  { %347 = vst [vmem:[%s777_s1 + $0x170] sm:$0xff] %v346_v46 }
  0x31   :  { %349 = vst [vmem:[%s777_s1 + $0x178] sm:$0xff] %v348_v47 }
  0x32   :  { %351 = vst [vmem:[%s777_s1 + $0x180] sm:$0xff] %v350_v48 }
  0x33   :  { %353 = vst [vmem:[%s777_s1 + $0x188] sm:$0xff] %v352_v49 }
  0x34   :  { %355 = vst [vmem:[%s777_s1 + $0x190] sm:$0xff] %v354_v50 }
  0x35   :  { %357 = vst [vmem:[%s777_s1 + $0x198] sm:$0xff] %v356_v51 }
  0x36   :  { %359 = vst [vmem:[%s777_s1 + $0x1a0] sm:$0xff] %v358_v52 }
  0x37   :  { %361 = vst [vmem:[%s777_s1 + $0x1a8] sm:$0xff] %v360_v53 }
  0x38   :  { %363 = vst [vmem:[%s777_s1 + $0x1b0] sm:$0xff] %v362_v54 }
  0x39   :  { %365 = vst [vmem:[%s777_s1 + $0x1b8] sm:$0xff] %v364_v55 }
  0x3a   :  { %367 = vst [vmem:[%s777_s1 + $0x1c0] sm:$0xff] %v366_v56 }
  0x3b   :  { %369 = vst [vmem:[%s777_s1 + $0x1c8] sm:$0xff] %v368_v57 }
  0x3c   :  { %371 = vst [vmem:[%s777_s1 + $0x1d0] sm:$0xff] %v370_v58 }
  0x3d   :  { %373 = vst [vmem:[%s777_s1 + $0x1d8] sm:$0xff] %v372_v59 }
  0x3e   :  { %375 = vst [vmem:[%s777_s1 + $0x1e0] sm:$0xff] %v374_v60 }
  0x3f   :  { %377 = vst [vmem:[%s777_s1 + $0x1e8] sm:$0xff] %v376_v61 }
  0x40   :  { %379 = vst [vmem:[%s777_s1 + $0x1f0] sm:$0xff] %v378_v62 }
  0x41   :  { %381 = vst [vmem:[%s777_s1 + $0x1f8] sm:$0xff] %v380_v63 }

// kernel: custom-call.2
= control target key start
LH: loop header
LB: loop body
LE: loop exit
PB: predicated region body
PF: predicated region fallthrough
CT: control target
= control target key end

     0   :  { %s105_s0 = inlined_call_operand.vmem [shape: f32[2,8,16,16], index: 0, kind: input, shape index: {}]   ;;  %s106_s1 = inlined_call_operand.vmem [shape: f32[2,8,16,16], index: 1, kind: input, shape index: {}]   ;;  %s107_s2 = inlined_call_operand.hbm [shape: c64[2,8,16,16], index: 2, kind: output, shape index: {}]  }
   0x1   :  { %s3_s11 = scalar_lea.hbm %s107_s2, 256 }
   0x2   :  { %4 = vsyncpa [#allocation0], 0  ;;  %s6_s14 = sshll.u32 %s105_s0, 4  ;;  %s8_s17 = sshll.u32 %s107_s2, 4  ;;  %s7_s14 = int_to_ptr.vmem [resolvable:$true] %s6_s14  ;;  %s9_s17 = int_to_ptr.hbm [resolvable:$true] %s8_s17 }
   0x3   :  { %11 = dma.vmem_to_hbm [thread:$0]  %s7_s14, 4096, %s9_s17, [#allocation0] }
   0x4   :  { %74 = dma.done.wait [#allocation0], 4096  }
   0x5   :  { %75 = vsyncadd [#allocation0], 4294963200 }
   0x6   :  { %14 = vsyncpa [#allocation0], 1 }
   0x7   :  { %15 = vsyncpa [#allocation1], 0  ;;  %s17_s20 = sshll.u32 %s106_s1, 4  ;;  %s19_s21 = sshll.u32 %s3_s11, 4  ;;  %s18_s20 = int_to_ptr.vmem [resolvable:$true] %s17_s20  ;;  %s20_s21 = int_to_ptr.hbm [resolvable:$true] %s19_s21 }
   0x8   :  { %22 = dma.vmem_to_hbm [thread:$0]  %s18_s20, 4096, %s20_s21, [#allocation1] }
   0x9   :  { %76 = dma.done.wait [#allocation1], 4096  }
   0xa   :  { %77 = vsyncadd [#allocation1], 4294963200 }
   0xb   :  { %25 = vsyncpa [#allocation1], 1 }

// kernel: _complex_conv2d_forward.1
= control target key start
LH: loop header
LB: loop body
LE: loop exit
PB: predicated region body
PF: predicated region fallthrough
CT: control target
= control target key end

     0   :  { %vm376_vm0 = vcmask 1043456   ;;  %vm279_vm1 = vcmask 588800   ;;  %vm613_vm2 = vcmask 125952   ;;  %s1398_s1 = inlined_call_operand.vmem [shape: bf16[72,16], index: 1, kind: input, shape index: {}]   ;;  %s1399_s2 = inlined_call_operand.vmem [shape: f32[1,16], index: 2, kind: input, shape index: {}]   ;;  %s1400_s0 = inlined_call_operand.vmem [shape: bf16[512,72], index: 0, kind: input, shape index: {}]   ;;  %s1401_s3 = inlined_call_operand.vmem [shape: bf16[512,16], index: 3, kind: output, shape index: {}]  }
   0x1   :  { %v87_v0 = vld [vmem:[%s1398_s1 + $0x20] sm:$0xf]  ;;  %v893_v4 = vld [vmem:[%s1398_s1 + $0x18] sm:$0xff]  ;;  %v892_v5 = vld [vmem:[%s1398_s1 + $0x10] sm:$0xff] }
   0x2   :  { %v269_v1 = vunpack.c.l.b16 %v87_v0  ;;  %v891_v6 = vld [vmem:[%s1398_s1 + $0x8] sm:$0xff]  ;;  %v890_v7 = vld [vmem:[%s1398_s1] sm:$0xff]  ;;  %v860_v16 = vld [vmem:[%s1400_s0 + $0x10] sm:$0xff] }
   0x3   :  { %v858_v8 = vld [vmem:[%s1400_s0] sm:$0xff]  ;;  %v859_v12 = vld [vmem:[%s1400_s0 + $0x8] sm:$0xff]  ;;  %v868_v17 = vld [vmem:[%s1400_s0 + $0x50] sm:$0xff] }
   0x4   :  { %v274_v2 = vpack.c.b16 %v269_v1, %v269_v1  ;;  %v866_v9 = vld [vmem:[%s1400_s0 + $0x40] sm:$0xff]  ;;  %v867_v13 = vld [vmem:[%s1400_s0 + $0x48] sm:$0xff]  ;;  %v876_v18 = vld [vmem:[%s1400_s0 + $0x90] sm:$0xff] }
   0x5   :  { %v874_v10 = vld [vmem:[%s1400_s0 + $0x80] sm:$0xff]  ;;  %v875_v14 = vld [vmem:[%s1400_s0 + $0x88] sm:$0xff]  ;;  %v884_v19 = vld [vmem:[%s1400_s0 + $0xd0] sm:$0xff] }
   0x6   :  { %v378_v3 = vsel %vm376_vm0, %v274_v2, 0  ;;  %v882_v11 = vld [vmem:[%s1400_s0 + $0xc0] sm:$0xff]  ;;  %v883_v15 = vld [vmem:[%s1400_s0 + $0xc8] sm:$0xff]  ;;  %v861_v20 = vld [vmem:[%s1400_s0 + $0x18] sm:$0xff] }
   0x7   :  { %383 = vmatpush.bf16.msra.mxu0 %v378_v3  ;;  %894 = vmatpush.bf16.msra.mxu1 %v378_v3  ;;  %v869_v21 = vld [vmem:[%s1400_s0 + $0x58] sm:$0xff]  ;;  %v862_v24 = vld [vmem:[%s1400_s0 + $0x20] sm:$0xff]  ;;  %v863_v28 = vld [vmem:[%s1400_s0 + $0x28] sm:$0xff] }
   0x8   :  { %895 = vmatpush.bf16.msra.mxu2 %v378_v3  ;;  %896 = vmatpush.bf16.msra.mxu3 %v378_v3  ;;  %v877_v22 = vld [vmem:[%s1400_s0 + $0x98] sm:$0xff]  ;;  %v870_v25 = vld [vmem:[%s1400_s0 + $0x60] sm:$0xff]  ;;  %v871_v29 = vld [vmem:[%s1400_s0 + $0x68] sm:$0xff] }
   0x9   :  { %v885_v23 = vld [vmem:[%s1400_s0 + $0xd8] sm:$0xff]  ;;  %v878_v26 = vld [vmem:[%s1400_s0 + $0xa0] sm:$0xff]  ;;  %v879_v30 = vld [vmem:[%s1400_s0 + $0xa8] sm:$0xff] }
   0xa   :  { %v886_v27 = vld [vmem:[%s1400_s0 + $0xe0] sm:$0xff]  ;;  %v887_v31 = vld [vmem:[%s1400_s0 + $0xe8] sm:$0xff]  ;;  %v864_v32 = vld [vmem:[%s1400_s0 + $0x30] sm:$0xff] }
   0xb   :  { %384 = vmatpush.bf16.msra.mxu0 %v893_v4  ;;  %897 = vmatpush.bf16.msra.mxu1 %v893_v4  ;;  %v872_v33 = vld [vmem:[%s1400_s0 + $0x70] sm:$0xff]  ;;  %v865_v36 = vld [vmem:[%s1400_s0 + $0x38] sm:$0xff]  ;;  %v1076_v40 = vld [vmem:[%s1399_s2] ss:$0 sm:$0xff] }
   0xc   :  { %898 = vmatpush.bf16.msra.mxu2 %v893_v4  ;;  %899 = vmatpush.bf16.msra.mxu3 %v893_v4  ;;  %v880_v34 = vld [vmem:[%s1400_s0 + $0xb0] sm:$0xff]  ;;  %v873_v37 = vld [vmem:[%s1400_s0 + $0x78] sm:$0xff] }
   0xd   :  { %v888_v35 = vld [vmem:[%s1400_s0 + $0xf0] sm:$0xff]  ;;  %v881_v38 = vld [vmem:[%s1400_s0 + $0xb8] sm:$0xff] }
   0xe   :  { %v889_v39 = vld [vmem:[%s1400_s0 + $0xf8] sm:$0xff] }
   0xf   :  { %385 = vmatpush.bf16.msra.mxu0 %v892_v5  ;;  %900 = vmatpush.bf16.msra.mxu1 %v892_v5 }
  0x10   :  { %901 = vmatpush.bf16.msra.mxu2 %v892_v5  ;;  %902 = vmatpush.bf16.msra.mxu3 %v892_v5 }
  0x13   :  { %386 = vmatpush.bf16.msra.mxu0 %v891_v6  ;;  %903 = vmatpush.bf16.msra.mxu1 %v891_v6 }
  0x14   :  { %904 = vmatpush.bf16.msra.mxu2 %v891_v6  ;;  %905 = vmatpush.bf16.msra.mxu3 %v891_v6 }
  0x17   :  { %387 = vmatpush.bf16.msra.mxu0 %v890_v7  ;;  %906 = vmatpush.bf16.msra.mxu1 %v890_v7 }
  0x18   :  { %907 = vmatpush.bf16.msra.mxu2 %v890_v7  ;;  %908 = vmatpush.bf16.msra.mxu3 %v890_v7 }
  0x1a   :  { %826 = vmatmul.msk.bf16.vlgmr.msra.gmra.mxu0 %vm279_vm1, %v858_v8  ;;  %834 = vmatmul.msk.bf16.vlgmr.msra.gmra.mxu1 %vm279_vm1, %v866_v9 }
  0x1b   :  { %842 = vmatmul.msk.bf16.vlgmr.msra.gmra.mxu2 %vm279_vm1, %v874_v10  ;;  %850 = vmatmul.msk.bf16.vlgmr.msra.gmra.mxu3 %vm279_vm1, %v882_v11 }
  0x2a   :  { %827 = vmatmul.msk.bf16.gmra.mxu0 %vm279_vm1, %v859_v12  ;;  %835 = vmatmul.msk.bf16.gmra.mxu1 %vm279_vm1, %v867_v13 }
  0x2b   :  { %843 = vmatmul.msk.bf16.gmra.mxu2 %vm279_vm1, %v875_v14  ;;  %851 = vmatmul.msk.bf16.gmra.mxu3 %vm279_vm1, %v883_v15 }
  0x3a   :  { %828 = vmatmul.msk.bf16.gmra.mxu0 %vm279_vm1, %v860_v16  ;;  %836 = vmatmul.msk.bf16.gmra.mxu1 %vm279_vm1, %v868_v17 }
  0x3b   :  { %844 = vmatmul.msk.bf16.gmra.mxu2 %vm279_vm1, %v876_v18  ;;  %852 = vmatmul.msk.bf16.gmra.mxu3 %vm279_vm1, %v884_v19 }
  0x4a   :  { %829 = vmatmul.msk.bf16.gmra.mxu0 %vm279_vm1, %v861_v20  ;;  %837 = vmatmul.msk.bf16.gmra.mxu1 %vm279_vm1, %v869_v21 }
  0x4b   :  { %845 = vmatmul.msk.bf16.gmra.mxu2 %vm279_vm1, %v877_v22  ;;  %853 = vmatmul.msk.bf16.gmra.mxu3 %vm279_vm1, %v885_v23 }
  0x5a   :  { %830 = vmatmul.msk.bf16.gmra.mxu0 %vm279_vm1, %v862_v24  ;;  %838 = vmatmul.msk.bf16.gmra.mxu1 %vm279_vm1, %v870_v25 }
  0x5b   :  { %846 = vmatmul.msk.bf16.gmra.mxu2 %vm279_vm1, %v878_v26  ;;  %854 = vmatmul.msk.bf16.gmra.mxu3 %vm279_vm1, %v886_v27 }
  0x6a   :  { %831 = vmatmul.msk.bf16.gmra.mxu0 %vm279_vm1, %v863_v28  ;;  %839 = vmatmul.msk.bf16.gmra.mxu1 %vm279_vm1, %v871_v29 }
  0x6b   :  { %847 = vmatmul.msk.bf16.gmra.mxu2 %vm279_vm1, %v879_v30  ;;  %855 = vmatmul.msk.bf16.gmra.mxu3 %vm279_vm1, %v887_v31 }
  0x7a   :  { %832 = vmatmul.msk.bf16.gmra.mxu0 %vm279_vm1, %v864_v32  ;;  %840 = vmatmul.msk.bf16.gmra.mxu1 %vm279_vm1, %v872_v33 }
  0x7b   :  { %848 = vmatmul.msk.bf16.gmra.mxu2 %vm279_vm1, %v880_v34  ;;  %856 = vmatmul.msk.bf16.gmra.mxu3 %vm279_vm1, %v888_v35 }
  0x8a   :  { %833 = vmatmul.msk.bf16.gmra.mxu0 %vm279_vm1, %v865_v36  ;;  %841 = vmatmul.msk.bf16.gmra.mxu1 %vm279_vm1, %v873_v37 }
  0x8b   :  { %849 = vmatmul.msk.bf16.gmra.mxu2 %vm279_vm1, %v881_v38  ;;  %857 = vmatmul.msk.bf16.gmra.mxu3 %vm279_vm1, %v889_v39 }
  0x97   :  { %v389_v41 = vpop.f32.mrf.mxu0  ;;  %v429_v42 = vpop.f32.mrf.mxu1 }
  0x98   :  { %v390_v43 = vadd.f32 %v1076_v40, %v389_v41  ;;  %v430_v44 = vadd.f32 %v1076_v40, %v429_v42 }
  0x9a   :  { %v549_v45 = vpack.c.bf16 %v390_v43, %v390_v43  ;;  %v565_v46 = vpack.c.bf16 %v430_v44, %v430_v44 }
  0x9c   :  { %614 = vst.msk [vmem:[%s1401_s3] sm:$0xf] %vm613_vm2, %v549_v45 }
  0x9d   :  { %630 = vst.msk [vmem:[%s1401_s3 + $0x40] sm:$0xf] %vm613_vm2, %v565_v46 }
  0x9e   :  { %v469_v47 = vpop.f32.mrf.mxu2  ;;  %v509_v48 = vpop.f32.mrf.mxu3 }
  0x9f   :  { %v470_v49 = vadd.f32 %v1076_v40, %v469_v47  ;;  %v510_v50 = vadd.f32 %v1076_v40, %v509_v48  ;;  %v391_v51 = vpop.f32.mrf.mxu0  ;;  %v431_v52 = vpop.f32.mrf.mxu1 }
  0xa0   :  { %v392_v53 = vadd.f32 %v1076_v40, %v391_v51  ;;  %v432_v54 = vadd.f32 %v1076_v40, %v431_v52 }
  0xa1   :  { %v581_v55 = vpack.c.bf16 %v470_v49, %v470_v49  ;;  %v597_v56 = vpack.c.bf16 %v510_v50, %v510_v50 }
  0xa2   :  { %v550_v57 = vpack.c.bf16 %v392_v53, %v392_v53  ;;  %v566_v58 = vpack.c.bf16 %v432_v54, %v432_v54 }
  0xa3   :  { %646 = vst.msk [vmem:[%s1401_s3 + $0x80] sm:$0xf] %vm613_vm2, %v581_v55 }
  0xa4   :  { %662 = vst.msk [vmem:[%s1401_s3 + $0xc0] sm:$0xf] %vm613_vm2, %v597_v56 }
  0xa5   :  { %615 = vst.msk [vmem:[%s1401_s3 + $0x4] sm:$0xf] %vm613_vm2, %v550_v57 }
  0xa6   :  { %631 = vst.msk [vmem:[%s1401_s3 + $0x44] sm:$0xf] %vm613_vm2, %v566_v58  ;;  %v471_v59 = vpop.f32.mrf.mxu2  ;;  %v511_v60 = vpop.f32.mrf.mxu3 }
  0xa7   :  { %v472_v61 = vadd.f32 %v1076_v40, %v471_v59  ;;  %v512_v62 = vadd.f32 %v1076_v40, %v511_v60  ;;  %v394_v63 = vpop.f32.mrf.mxu0  ;;  %v434_v0 = vpop.f32.mrf.mxu1 }
  0xa8   :  { %v395_v1 = vadd.f32 %v1076_v40, %v394_v63  ;;  %v435_v2 = vadd.f32 %v1076_v40, %v434_v0 }
  0xa9   :  { %v582_v3 = vpack.c.bf16 %v472_v61, %v472_v61  ;;  %v598_v4 = vpack.c.bf16 %v512_v62, %v512_v62 }
  0xaa   :  { %v551_v5 = vpack.c.bf16 %v395_v1, %v395_v1  ;;  %v567_v6 = vpack.c.bf16 %v435_v2, %v435_v2 }
  0xab   :  { %647 = vst.msk [vmem:[%s1401_s3 + $0x84] sm:$0xf] %vm613_vm2, %v582_v3 }
  0xac   :  { %663 = vst.msk [vmem:[%s1401_s3 + $0xc4] sm:$0xf] %vm613_vm2, %v598_v4 }
  0xad   :  { %616 = vst.msk [vmem:[%s1401_s3 + $0x8] sm:$0xf] %vm613_vm2, %v551_v5 }
  0xae   :  { %632 = vst.msk [vmem:[%s1401_s3 + $0x48] sm:$0xf] %vm613_vm2, %v567_v6  ;;  %v474_v7 = vpop.f32.mrf.mxu2  ;;  %v514_v8 = vpop.f32.mrf.mxu3 }
  0xaf   :  { %v475_v9 = vadd.f32 %v1076_v40, %v474_v7  ;;  %v515_v10 = vadd.f32 %v1076_v40, %v514_v8  ;;  %v396_v11 = vpop.f32.mrf.mxu0  ;;  %v436_v12 = vpop.f32.mrf.mxu1 }
  0xb0   :  { %v397_v13 = vadd.f32 %v1076_v40, %v396_v11  ;;  %v437_v14 = vadd.f32 %v1076_v40, %v436_v12 }
  0xb1   :  { %v583_v15 = vpack.c.bf16 %v475_v9, %v475_v9  ;;  %v599_v16 = vpack.c.bf16 %v515_v10, %v515_v10 }
  0xb2   :  { %v552_v17 = vpack.c.bf16 %v397_v13, %v397_v13  ;;  %v568_v18 = vpack.c.bf16 %v437_v14, %v437_v14 }
  0xb3   :  { %648 = vst.msk [vmem:[%s1401_s3 + $0x88] sm:$0xf] %vm613_vm2, %v583_v15 }
  0xb4   :  { %664 = vst.msk [vmem:[%s1401_s3 + $0xc8] sm:$0xf] %vm613_vm2, %v599_v16 }
  0xb5   :  { %617 = vst.msk [vmem:[%s1401_s3 + $0xc] sm:$0xf] %vm613_vm2, %v552_v17 }
  0xb6   :  { %633 = vst.msk [vmem:[%s1401_s3 + $0x4c] sm:$0xf] %vm613_vm2, %v568_v18  ;;  %v476_v19 = vpop.f32.mrf.mxu2  ;;  %v516_v20 = vpop.f32.mrf.mxu3 }
  0xb7   :  { %v477_v21 = vadd.f32 %v1076_v40, %v476_v19  ;;  %v517_v22 = vadd.f32 %v1076_v40, %v516_v20  ;;  %v399_v23 = vpop.f32.mrf.mxu0  ;;  %v439_v24 = vpop.f32.mrf.mxu1 }
  0xb8   :  { %v400_v25 = vadd.f32 %v1076_v40, %v399_v23  ;;  %v440_v26 = vadd.f32 %v1076_v40, %v439_v24 }
  0xb9   :  { %v584_v27 = vpack.c.bf16 %v477_v21, %v477_v21  ;;  %v600_v28 = vpack.c.bf16 %v517_v22, %v517_v22 }
  0xba   :  { %v553_v29 = vpack.c.bf16 %v400_v25, %v400_v25  ;;  %v569_v30 = vpack.c.bf16 %v440_v26, %v440_v26 }
  0xbb   :  { %649 = vst.msk [vmem:[%s1401_s3 + $0x8c] sm:$0xf] %vm613_vm2, %v584_v27 }
  0xbc   :  { %665 = vst.msk [vmem:[%s1401_s3 + $0xcc] sm:$0xf] %vm613_vm2, %v600_v28 }
  0xbd   :  { %618 = vst.msk [vmem:[%s1401_s3 + $0x10] sm:$0xf] %vm613_vm2, %v553_v29 }
  0xbe   :  { %634 = vst.msk [vmem:[%s1401_s3 + $0x50] sm:$0xf] %vm613_vm2, %v569_v30  ;;  %v479_v31 = vpop.f32.mrf.mxu2  ;;  %v519_v32 = vpop.f32.mrf.mxu3 }
  0xbf   :  { %v480_v33 = vadd.f32 %v1076_v40, %v479_v31  ;;  %v520_v34 = vadd.f32 %v1076_v40, %v519_v32  ;;  %v401_v35 = vpop.f32.mrf.mxu0  ;;  %v441_v36 = vpop.f32.mrf.mxu1 }
  0xc0   :  { %v402_v37 = vadd.f32 %v1076_v40, %v401_v35  ;;  %v442_v38 = vadd.f32 %v1076_v40, %v441_v36 }
  0xc1   :  { %v585_v39 = vpack.c.bf16 %v480_v33, %v480_v33  ;;  %v601_v41 = vpack.c.bf16 %v520_v34, %v520_v34 }
  0xc2   :  { %v554_v42 = vpack.c.bf16 %v402_v37, %v402_v37  ;;  %v570_v43 = vpack.c.bf16 %v442_v38, %v442_v38 }
  0xc3   :  { %650 = vst.msk [vmem:[%s1401_s3 + $0x90] sm:$0xf] %vm613_vm2, %v585_v39 }
  0xc4   :  { %666 = vst.msk [vmem:[%s1401_s3 + $0xd0] sm:$0xf] %vm613_vm2, %v601_v41 }
  0xc5   :  { %619 = vst.msk [vmem:[%s1401_s3 + $0x14] sm:$0xf] %vm613_vm2, %v554_v42 }
  0xc6   :  { %635 = vst.msk [vmem:[%s1401_s3 + $0x54] sm:$0xf] %vm613_vm2, %v570_v43  ;;  %v481_v44 = vpop.f32.mrf.mxu2  ;;  %v521_v45 = vpop.f32.mrf.mxu3 }
  0xc7   :  { %v482_v46 = vadd.f32 %v1076_v40, %v481_v44  ;;  %v522_v47 = vadd.f32 %v1076_v40, %v521_v45  ;;  %v404_v48 = vpop.f32.mrf.mxu0  ;;  %v444_v49 = vpop.f32.mrf.mxu1 }
  0xc8   :  { %v405_v50 = vadd.f32 %v1076_v40, %v404_v48  ;;  %v445_v51 = vadd.f32 %v1076_v40, %v444_v49 }
  0xc9   :  { %v586_v52 = vpack.c.bf16 %v482_v46, %v482_v46  ;;  %v602_v53 = vpack.c.bf16 %v522_v47, %v522_v47 }
  0xca   :  { %v555_v54 = vpack.c.bf16 %v405_v50, %v405_v50  ;;  %v571_v55 = vpack.c.bf16 %v445_v51, %v445_v51 }
  0xcb   :  { %651 = vst.msk [vmem:[%s1401_s3 + $0x94] sm:$0xf] %vm613_vm2, %v586_v52 }
  0xcc   :  { %667 = vst.msk [vmem:[%s1401_s3 + $0xd4] sm:$0xf] %vm613_vm2, %v602_v53 }
  0xcd   :  { %620 = vst.msk [vmem:[%s1401_s3 + $0x18] sm:$0xf] %vm613_vm2, %v555_v54 }
  0xce   :  { %636 = vst.msk [vmem:[%s1401_s3 + $0x58] sm:$0xf] %vm613_vm2, %v571_v55  ;;  %v484_v56 = vpop.f32.mrf.mxu2  ;;  %v524_v57 = vpop.f32.mrf.mxu3 }
  0xcf   :  { %v485_v58 = vadd.f32 %v1076_v40, %v484_v56  ;;  %v525_v59 = vadd.f32 %v1076_v40, %v524_v57  ;;  %v406_v60 = vpop.f32.mrf.mxu0  ;;  %v446_v61 = vpop.f32.mrf.mxu1 }
  0xd0   :  { %v407_v62 = vadd.f32 %v1076_v40, %v406_v60  ;;  %v447_v63 = vadd.f32 %v1076_v40, %v446_v61 }
  0xd1   :  { %v587_v0 = vpack.c.bf16 %v485_v58, %v485_v58  ;;  %v603_v1 = vpack.c.bf16 %v525_v59, %v525_v59 }
  0xd2   :  { %v556_v2 = vpack.c.bf16 %v407_v62, %v407_v62  ;;  %v572_v3 = vpack.c.bf16 %v447_v63, %v447_v63 }
  0xd3   :  { %652 = vst.msk [vmem:[%s1401_s3 + $0x98] sm:$0xf] %vm613_vm2, %v587_v0 }
  0xd4   :  { %668 = vst.msk [vmem:[%s1401_s3 + $0xd8] sm:$0xf] %vm613_vm2, %v603_v1 }
  0xd5   :  { %621 = vst.msk [vmem:[%s1401_s3 + $0x1c] sm:$0xf] %vm613_vm2, %v556_v2 }
  0xd6   :  { %637 = vst.msk [vmem:[%s1401_s3 + $0x5c] sm:$0xf] %vm613_vm2, %v572_v3  ;;  %v486_v4 = vpop.f32.mrf.mxu2  ;;  %v526_v5 = vpop.f32.mrf.mxu3 }
  0xd7   :  { %v487_v6 = vadd.f32 %v1076_v40, %v486_v4  ;;  %v527_v7 = vadd.f32 %v1076_v40, %v526_v5  ;;  %v409_v8 = vpop.f32.mrf.mxu0  ;;  %v449_v9 = vpop.f32.mrf.mxu1 }
  0xd8   :  { %v410_v10 = vadd.f32 %v1076_v40, %v409_v8  ;;  %v450_v11 = vadd.f32 %v1076_v40, %v449_v9 }
  0xd9   :  { %v588_v12 = vpack.c.bf16 %v487_v6, %v487_v6  ;;  %v604_v13 = vpack.c.bf16 %v527_v7, %v527_v7 }
  0xda   :  { %v557_v14 = vpack.c.bf16 %v410_v10, %v410_v10  ;;  %v573_v15 = vpack.c.bf16 %v450_v11, %v450_v11 }
  0xdb   :  { %653 = vst.msk [vmem:[%s1401_s3 + $0x9c] sm:$0xf] %vm613_vm2, %v588_v12 }
  0xdc   :  { %669 = vst.msk [vmem:[%s1401_s3 + $0xdc] sm:$0xf] %vm613_vm2, %v604_v13 }
  0xdd   :  { %622 = vst.msk [vmem:[%s1401_s3 + $0x20] sm:$0xf] %vm613_vm2, %v557_v14 }
  0xde   :  { %638 = vst.msk [vmem:[%s1401_s3 + $0x60] sm:$0xf] %vm613_vm2, %v573_v15  ;;  %v489_v16 = vpop.f32.mrf.mxu2  ;;  %v529_v17 = vpop.f32.mrf.mxu3 }
  0xdf   :  { %v490_v18 = vadd.f32 %v1076_v40, %v489_v16  ;;  %v530_v19 = vadd.f32 %v1076_v40, %v529_v17  ;;  %v411_v20 = vpop.f32.mrf.mxu0  ;;  %v451_v21 = vpop.f32.mrf.mxu1 }
  0xe0   :  { %v412_v22 = vadd.f32 %v1076_v40, %v411_v20  ;;  %v452_v23 = vadd.f32 %v1076_v40, %v451_v21 }
  0xe1   :  { %v589_v24 = vpack.c.bf16 %v490_v18, %v490_v18  ;;  %v605_v25 = vpack.c.bf16 %v530_v19, %v530_v19 }
  0xe2   :  { %v558_v26 = vpack.c.bf16 %v412_v22, %v412_v22  ;;  %v574_v27 = vpack.c.bf16 %v452_v23, %v452_v23 }
  0xe3   :  { %654 = vst.msk [vmem:[%s1401_s3 + $0xa0] sm:$0xf] %vm613_vm2, %v589_v24 }
  0xe4   :  { %670 = vst.msk [vmem:[%s1401_s3 + $0xe0] sm:$0xf] %vm613_vm2, %v605_v25 }
  0xe5   :  { %623 = vst.msk [vmem:[%s1401_s3 + $0x24] sm:$0xf] %vm613_vm2, %v558_v26 }
  0xe6   :  { %639 = vst.msk [vmem:[%s1401_s3 + $0x64] sm:$0xf] %vm613_vm2, %v574_v27  ;;  %v491_v28 = vpop.f32.mrf.mxu2  ;;  %v531_v29 = vpop.f32.mrf.mxu3 }
  0xe7   :  { %v492_v30 = vadd.f32 %v1076_v40, %v491_v28  ;;  %v532_v31 = vadd.f32 %v1076_v40, %v531_v29  ;;  %v414_v32 = vpop.f32.mrf.mxu0  ;;  %v454_v33 = vpop.f32.mrf.mxu1 }
  0xe8   :  { %v415_v34 = vadd.f32 %v1076_v40, %v414_v32  ;;  %v455_v35 = vadd.f32 %v1076_v40, %v454_v33 }
  0xe9   :  { %v590_v36 = vpack.c.bf16 %v492_v30, %v492_v30  ;;  %v606_v37 = vpack.c.bf16 %v532_v31, %v532_v31 }
  0xea   :  { %v559_v38 = vpack.c.bf16 %v415_v34, %v415_v34  ;;  %v575_v39 = vpack.c.bf16 %v455_v35, %v455_v35 }
  0xeb   :  { %655 = vst.msk [vmem:[%s1401_s3 + $0xa4] sm:$0xf] %vm613_vm2, %v590_v36 }
  0xec   :  { %671 = vst.msk [vmem:[%s1401_s3 + $0xe4] sm:$0xf] %vm613_vm2, %v606_v37 }
  0xed   :  { %624 = vst.msk [vmem:[%s1401_s3 + $0x28] sm:$0xf] %vm613_vm2, %v559_v38 }
  0xee   :  { %640 = vst.msk [vmem:[%s1401_s3 + $0x68] sm:$0xf] %vm613_vm2, %v575_v39  ;;  %v494_v41 = vpop.f32.mrf.mxu2  ;;  %v534_v42 = vpop.f32.mrf.mxu3 }
  0xef   :  { %v495_v43 = vadd.f32 %v1076_v40, %v494_v41  ;;  %v535_v44 = vadd.f32 %v1076_v40, %v534_v42  ;;  %v416_v45 = vpop.f32.mrf.mxu0  ;;  %v456_v46 = vpop.f32.mrf.mxu1 }
  0xf0   :  { %v417_v47 = vadd.f32 %v1076_v40, %v416_v45  ;;  %v457_v48 = vadd.f32 %v1076_v40, %v456_v46 }
  0xf1   :  { %v591_v49 = vpack.c.bf16 %v495_v43, %v495_v43  ;;  %v607_v50 = vpack.c.bf16 %v535_v44, %v535_v44 }
  0xf2   :  { %v560_v51 = vpack.c.bf16 %v417_v47, %v417_v47  ;;  %v576_v52 = vpack.c.bf16 %v457_v48, %v457_v48 }
  0xf3   :  { %656 = vst.msk [vmem:[%s1401_s3 + $0xa8] sm:$0xf] %vm613_vm2, %v591_v49 }
  0xf4   :  { %672 = vst.msk [vmem:[%s1401_s3 + $0xe8] sm:$0xf] %vm613_vm2, %v607_v50 }
  0xf5   :  { %625 = vst.msk [vmem:[%s1401_s3 + $0x2c] sm:$0xf] %vm613_vm2, %v560_v51 }
  0xf6   :  { %641 = vst.msk [vmem:[%s1401_s3 + $0x6c] sm:$0xf] %vm613_vm2, %v576_v52  ;;  %v496_v53 = vpop.f32.mrf.mxu2  ;;  %v536_v54 = vpop.f32.mrf.mxu3 }
  0xf7   :  { %v497_v55 = vadd.f32 %v1076_v40, %v496_v53  ;;  %v537_v56 = vadd.f32 %v1076_v40, %v536_v54  ;;  %v419_v57 = vpop.f32.mrf.mxu0  ;;  %v459_v58 = vpop.f32.mrf.mxu1 }
  0xf8   :  { %v420_v59 = vadd.f32 %v1076_v40, %v419_v57  ;;  %v460_v60 = vadd.f32 %v1076_v40, %v459_v58 }
  0xf9   :  { %v592_v61 = vpack.c.bf16 %v497_v55, %v497_v55  ;;  %v608_v62 = vpack.c.bf16 %v537_v56, %v537_v56 }
  0xfa   :  { %v561_v63 = vpack.c.bf16 %v420_v59, %v420_v59  ;;  %v577_v0 = vpack.c.bf16 %v460_v60, %v460_v60 }
  0xfb   :  { %657 = vst.msk [vmem:[%s1401_s3 + $0xac] sm:$0xf] %vm613_vm2, %v592_v61 }
  0xfc   :  { %673 = vst.msk [vmem:[%s1401_s3 + $0xec] sm:$0xf] %vm613_vm2, %v608_v62 }
  0xfd   :  { %626 = vst.msk [vmem:[%s1401_s3 + $0x30] sm:$0xf] %vm613_vm2, %v561_v63 }
  0xfe   :  { %642 = vst.msk [vmem:[%s1401_s3 + $0x70] sm:$0xf] %vm613_vm2, %v577_v0  ;;  %v499_v1 = vpop.f32.mrf.mxu2  ;;  %v539_v2 = vpop.f32.mrf.mxu3 }
  0xff   :  { %v500_v3 = vadd.f32 %v1076_v40, %v499_v1  ;;  %v540_v4 = vadd.f32 %v1076_v40, %v539_v2  ;;  %v421_v5 = vpop.f32.mrf.mxu0  ;;  %v461_v6 = vpop.f32.mrf.mxu1 }
 0x100   :  { %v422_v7 = vadd.f32 %v1076_v40, %v421_v5  ;;  %v462_v8 = vadd.f32 %v1076_v40, %v461_v6 }
 0x101   :  { %v593_v9 = vpack.c.bf16 %v500_v3, %v500_v3  ;;  %v609_v10 = vpack.c.bf16 %v540_v4, %v540_v4 }
 0x102   :  { %v562_v11 = vpack.c.bf16 %v422_v7, %v422_v7  ;;  %v578_v12 = vpack.c.bf16 %v462_v8, %v462_v8 }
 0x103   :  { %658 = vst.msk [vmem:[%s1401_s3 + $0xb0] sm:$0xf] %vm613_vm2, %v593_v9 }
 0x104   :  { %674 = vst.msk [vmem:[%s1401_s3 + $0xf0] sm:$0xf] %vm613_vm2, %v609_v10 }
 0x105   :  { %627 = vst.msk [vmem:[%s1401_s3 + $0x34] sm:$0xf] %vm613_vm2, %v562_v11 }
 0x106   :  { %643 = vst.msk [vmem:[%s1401_s3 + $0x74] sm:$0xf] %vm613_vm2, %v578_v12  ;;  %v501_v13 = vpop.f32.mrf.mxu2  ;;  %v541_v14 = vpop.f32.mrf.mxu3 }
 0x107   :  { %v502_v15 = vadd.f32 %v1076_v40, %v501_v13  ;;  %v542_v16 = vadd.f32 %v1076_v40, %v541_v14  ;;  %v424_v17 = vpop.f32.mrf.mxu0  ;;  %v464_v18 = vpop.f32.mrf.mxu1 }
 0x108   :  { %v425_v19 = vadd.f32 %v1076_v40, %v424_v17  ;;  %v465_v20 = vadd.f32 %v1076_v40, %v464_v18 }
 0x109   :  { %v594_v21 = vpack.c.bf16 %v502_v15, %v502_v15  ;;  %v610_v22 = vpack.c.bf16 %v542_v16, %v542_v16 }
 0x10a   :  { %v563_v23 = vpack.c.bf16 %v425_v19, %v425_v19  ;;  %v579_v24 = vpack.c.bf16 %v465_v20, %v465_v20 }
 0x10b   :  { %659 = vst.msk [vmem:[%s1401_s3 + $0xb4] sm:$0xf] %vm613_vm2, %v594_v21 }
 0x10c   :  { %675 = vst.msk [vmem:[%s1401_s3 + $0xf4] sm:$0xf] %vm613_vm2, %v610_v22 }
 0x10d   :  { %628 = vst.msk [vmem:[%s1401_s3 + $0x38] sm:$0xf] %vm613_vm2, %v563_v23 }
 0x10e   :  { %644 = vst.msk [vmem:[%s1401_s3 + $0x78] sm:$0xf] %vm613_vm2, %v579_v24  ;;  %v504_v25 = vpop.f32.mrf.mxu2  ;;  %v544_v26 = vpop.f32.mrf.mxu3 }
 0x10f   :  { %v505_v27 = vadd.f32 %v1076_v40, %v504_v25  ;;  %v545_v28 = vadd.f32 %v1076_v40, %v544_v26  ;;  %v426_v29 = vpop.f32.mrf.mxu0  ;;  %v466_v30 = vpop.f32.mrf.mxu1 }
 0x110   :  { %v427_v31 = vadd.f32 %v1076_v40, %v426_v29  ;;  %v467_v32 = vadd.f32 %v1076_v40, %v466_v30 }
 0x111   :  { %v595_v33 = vpack.c.bf16 %v505_v27, %v505_v27  ;;  %v611_v34 = vpack.c.bf16 %v545_v28, %v545_v28 }
 0x112   :  { %v564_v35 = vpack.c.bf16 %v427_v31, %v427_v31  ;;  %v580_v36 = vpack.c.bf16 %v467_v32, %v467_v32 }
 0x113   :  { %660 = vst.msk [vmem:[%s1401_s3 + $0xb8] sm:$0xf] %vm613_vm2, %v595_v33 }
 0x114   :  { %676 = vst.msk [vmem:[%s1401_s3 + $0xf8] sm:$0xf] %vm613_vm2, %v611_v34 }
 0x115   :  { %629 = vst.msk [vmem:[%s1401_s3 + $0x3c] sm:$0xf] %vm613_vm2, %v564_v35 }
 0x116   :  { %645 = vst.msk [vmem:[%s1401_s3 + $0x7c] sm:$0xf] %vm613_vm2, %v580_v36  ;;  %v506_v37 = vpop.f32.mrf.mxu2  ;;  %v546_v38 = vpop.f32.mrf.mxu3 }
 0x117   :  { %v507_v39 = vadd.f32 %v1076_v40, %v506_v37  ;;  %v547_v41 = vadd.f32 %v1076_v40, %v546_v38 }
 0x119   :  { %v596_v42 = vpack.c.bf16 %v507_v39, %v507_v39  ;;  %v612_v43 = vpack.c.bf16 %v547_v41, %v547_v41 }
 0x11b   :  { %661 = vst.msk [vmem:[%s1401_s3 + $0xbc] sm:$0xf] %vm613_vm2, %v596_v42 }
 0x11c   :  { %677 = vst.msk [vmem:[%s1401_s3 + $0xfc] sm:$0xf] %vm613_vm2, %v612_v43 }

</bundles_post_ra>
